<compile_context>
chip_gen: v7x
topology: tpu7x:2x2x1
jax: 0.10.0
libtpu: 0.0.40
codegen_flags: <defaults>
</compile_context>

<pallas_src>
import functools

import jax
import jax.numpy as jnp
from jax.experimental import pallas as pl
from jax.experimental.pallas import tpu as pltpu


def _rmsnorm_kernel(x_ref, e1_ref, e2_ref, g_ref, o_ref, *, eps):
    # x_ref: (tn, HD) lane-dense input tile
    # e1_ref: (HD, H) 0/1 head indicator, e2_ref: (H, HD) = e1.T (both f32)
    # g_ref: (1, HD) = gamma * scale (f32)
    xf = x_ref[...].astype(jnp.float32)                      # torch .float()

    # Per-head sum of squares via a skinny MXU matmul (row-local -> padded
    # rows of a ragged last block cannot contaminate valid rows).
    sq = jnp.dot(xf * xf, e1_ref[...],
                 preferred_element_type=jnp.float32)          # (tn, H)
    inv = jax.lax.rsqrt(jnp.maximum(sq, eps * eps))           # EUP, narrow tile

    # Broadcast per-head inverse norm back to per-column with a tiny matmul.
    inv_b = jnp.dot(inv, e2_ref[...],
                    preferred_element_type=jnp.float32)       # (tn, HD)

    o_ref[...] = (xf * inv_b * g_ref[...]).astype(o_ref.dtype)


def sparse_multihead_rmsnorm(x, gamma, *, tile_n=2048):
    """x: (N, heads, dim) float; gamma: (heads, dim). Returns same shape/dtype."""
    N, H, D = x.shape
    assert gamma.shape == (H, D)
    HD = H * D
    scale = float(D) ** 0.5
    eps = 1e-12

    # Pure layout reshape: heads and dim are contiguous -> lane-dense last axis.
    x2 = x.reshape(N, HD)
    # Fold scale + f32 cast into gamma once, outside the kernel.
    g = (gamma.astype(jnp.float32) * scale).reshape(1, HD)

    # Precomputed 0/1 head-indicator matrices (exact in f32), VMEM-resident.
    head_of_col = jnp.arange(HD, dtype=jnp.int32) // D
    e1 = (head_of_col[:, None] == jnp.arange(H, dtype=jnp.int32)[None, :]
          ).astype(jnp.float32)                               # (HD, H)
    e2 = e1.T                                                 # (H, HD)

    # Token tile: large (amortizes per-step overhead), multiple of 8 sublanes
    # when it does not cover the whole array. Ragged last block is masked by
    # Pallas, so no pad / slice and no divisibility requirement on N.
    tn = max(8, min(int(tile_n), N))
    if tn < N:
        tn = (tn // 8) * 8
    grid_n = pl.cdiv(N, tn)

    kernel = functools.partial(_rmsnorm_kernel, eps=eps)

    out2 = pl.pallas_call(
        kernel,
        out_shape=jax.ShapeDtypeStruct((N, HD), x.dtype),
        grid_spec=pltpu.PrefetchScalarGridSpec(
            num_scalar_prefetch=0,
            grid=(grid_n,),
            in_specs=[
                pl.BlockSpec((tn, HD), lambda i: (i, 0)),     # x tile (lane-dense)
                pl.BlockSpec((HD, H), lambda i: (0, 0)),      # E1, resident
                pl.BlockSpec((H, HD), lambda i: (0, 0)),      # E2, resident
                pl.BlockSpec((1, HD), lambda i: (0, 0)),      # gamma*scale, resident
            ],
            out_specs=pl.BlockSpec((tn, HD), lambda i: (i, 0)),
        ),
        compiler_params=pltpu.CompilerParams(
            dimension_semantics=("parallel",),
            vmem_limit_bytes=64 * 1024 * 1024,
        ),
    )(x2, e1, e2, g)

    return out2.reshape(N, H, D)


def _reference(x, gamma):
    scale = float(x.shape[-1]) ** 0.5
    xf = x.astype(jnp.float32)
    norm = jnp.maximum(jnp.sqrt(jnp.sum(xf * xf, axis=-1, keepdims=True)), 1e-12)
    y = (xf / norm) * gamma.astype(jnp.float32) * scale
    return y.astype(x.dtype)


if __name__ == "__main__":
    # Small shapes consistent with the module: N sparse tokens, heads, per-head dim.
    N, HEADS, DIM = 64, 4, 64
    key = jax.random.PRNGKey(0)
    x = jax.random.normal(key, (N, HEADS, DIM), dtype=jnp.float32).astype(jnp.bfloat16)
    # Parameter init exactly as nn.Parameter(torch.ones(heads, dim))
    gamma = jnp.ones((HEADS, DIM), dtype=jnp.float32)

    out = jax.block_until_ready(sparse_multihead_rmsnorm(x, gamma))
    ref = _reference(x, gamma)

    assert out.shape == x.shape and out.dtype == x.dtype
    err = jnp.max(jnp.abs(out.astype(jnp.float32) - ref.astype(jnp.float32)))
    assert float(err) < 1e-1, f"max abs err too large: {err}"

    print("KERNEL_OK")
</pallas_src>

<mosaic_0001>
module attributes {stable_mosaic.version = 11 : i64} {
  func.func @_rmsnorm_kernel(%arg0: i32, %arg1: memref<64x256xbf16, #tpu.memory_space<vmem>>, %arg2: memref<256x4xf32, #tpu.memory_space<vmem>>, %arg3: memref<4x256xf32, #tpu.memory_space<vmem>>, %arg4: memref<1x256xf32, #tpu.memory_space<vmem>>, %arg5: memref<64x256xbf16, #tpu.memory_space<vmem>>) attributes {dimension_semantics = [#tpu.dimension_semantics<parallel>], iteration_bounds = array<i64: 1>, scalar_prefetch = 0 : i64, scratch_operands = 0 : i64, tpu.core_type = #tpu.core_type<tc>, window_params = [{transform_indices = @transform_0, window_bounds = array<i64: 64, 256>}, {pipeline_mode = #tpu.pipeline_mode<synchronous>, transform_indices = @transform_1, window_bounds = array<i64: 256, 4>}, {pipeline_mode = #tpu.pipeline_mode<synchronous>, transform_indices = @transform_2, window_bounds = array<i64: 4, 256>}, {pipeline_mode = #tpu.pipeline_mode<synchronous>, transform_indices = @transform_3, window_bounds = array<i64: 1, 256>}, {transform_indices = @transform_4, window_bounds = array<i64: 64, 256>}]} {
    %c0 = arith.constant 0 : index
    %c0_0 = arith.constant 0 : index
    %0 = vector.load %arg1[%c0, %c0_0] : memref<64x256xbf16, #tpu.memory_space<vmem>>, vector<64x256xbf16>
    %1 = arith.extf %0 : vector<64x256xbf16> to vector<64x256xf32>
    %2 = arith.mulf %1, %1 : vector<64x256xf32>
    %c0_1 = arith.constant 0 : index
    %c0_2 = arith.constant 0 : index
    %3 = vector.load %arg2[%c0_1, %c0_2] : memref<256x4xf32, #tpu.memory_space<vmem>>, vector<256x4xf32>
    %cst = arith.constant dense<0.000000e+00> : vector<64x4xf32>
    %4 = tpu.matmul %2, %3, %cst {dimension_numbers = #tpu.dot_dimension_numbers<[1], [0], [0], [1], [0, 0, 1, 1], [], []>} : vector<64x256xf32>, vector<256x4xf32>, vector<64x4xf32> -> vector<64x4xf32>
    %cst_3 = arith.constant 1.000000e-24 : f32
    %5 = vector.broadcast %cst_3 : f32 to vector<64x4xf32>
    %6 = arith.maximumf %4, %5 : vector<64x4xf32>
    %7 = math.rsqrt %6 : vector<64x4xf32>
    %c0_4 = arith.constant 0 : index
    %c0_5 = arith.constant 0 : index
    %8 = vector.load %arg3[%c0_4, %c0_5] : memref<4x256xf32, #tpu.memory_space<vmem>>, vector<4x256xf32>
    %cst_6 = arith.constant dense<0.000000e+00> : vector<64x256xf32>
    %9 = tpu.matmul %7, %8, %cst_6 {dimension_numbers = #tpu.dot_dimension_numbers<[1], [0], [0], [1], [0, 0, 1, 1], [], []>} : vector<64x4xf32>, vector<4x256xf32>, vector<64x256xf32> -> vector<64x256xf32>
    %10 = arith.mulf %1, %9 : vector<64x256xf32>
    %c0_7 = arith.constant 0 : index
    %c0_8 = arith.constant 0 : index
    %11 = vector.load %arg4[%c0_7, %c0_8] : memref<1x256xf32, #tpu.memory_space<vmem>>, vector<1x256xf32>
    %12 = vector.broadcast %11 : vector<1x256xf32> to vector<64x256xf32>
    %13 = arith.mulf %10, %12 : vector<64x256xf32>
    %14 = arith.truncf %13 : vector<64x256xf32> to vector<64x256xbf16>
    %c0_9 = arith.constant 0 : index
    %c0_10 = arith.constant 0 : index
    %15 = vector.load %arg5[%c0_9, %c0_10] : memref<64x256xbf16, #tpu.memory_space<vmem>>, vector<64x256xbf16>
    tpu.vector_store %arg5[%c0_9, %c0_10], %14 {strides = array<i32>} : memref<64x256xbf16, #tpu.memory_space<vmem>>, vector<64x256xbf16>,
    return
  }
  func.func @transform_0(%arg0: i32) -> (i32, i32) {
    %c0_i32 = arith.constant 0 : i32
    %c0_i32_0 = arith.constant 0 : i32
    return %arg0, %c0_i32 : i32, i32
  }
  func.func @transform_1(%arg0: i32) -> (i32, i32) {
    %c0_i32 = arith.constant 0 : i32
    %c0_i32_0 = arith.constant 0 : i32
    %c0_i32_1 = arith.constant 0 : i32
    return %c0_i32, %c0_i32_0 : i32, i32
  }
  func.func @transform_2(%arg0: i32) -> (i32, i32) {
    %c0_i32 = arith.constant 0 : i32
    %c0_i32_0 = arith.constant 0 : i32
    %c0_i32_1 = arith.constant 0 : i32
    return %c0_i32, %c0_i32_0 : i32, i32
  }
  func.func @transform_3(%arg0: i32) -> (i32, i32) {
    %c0_i32 = arith.constant 0 : i32
    %c0_i32_0 = arith.constant 0 : i32
    %c0_i32_1 = arith.constant 0 : i32
    return %c0_i32, %c0_i32_0 : i32, i32
  }
  func.func @transform_4(%arg0: i32) -> (i32, i32) {
    %c0_i32 = arith.constant 0 : i32
    %c0_i32_0 = arith.constant 0 : i32
    return %arg0, %c0_i32 : i32, i32
  }
}

</mosaic_0001>

<bundles_post_ra>
// kernel: tpu_custom_call.1
= control target key start
LH: loop header
LB: loop body
LE: loop exit
PB: predicated region body
PF: predicated region fallthrough
CT: control target
= control target key end

     0   :  { %9 = vsyncpa [#allocation3], 0  ;;  %s999_s0 = inlined_call_operand.hbm [shape: bf16[64,256], index: 0, kind: input, shape index: {}]   ;;  %s1000_s1 = inlined_call_operand.hbm [shape: f32[256,4], index: 1, kind: input, shape index: {}]   ;;  %s1001_s2 = inlined_call_operand.hbm [shape: f32[4,256], index: 2, kind: input, shape index: {}]   ;;  %s1002_s3 = inlined_call_operand.hbm [shape: f32[1,256], index: 3, kind: input, shape index: {}]   ;;  %s1003_s4 = inlined_call_operand.hbm [shape: bf16[64,256], index: 4, kind: output, shape index: {}]  }
   0x1   :  { %10 = vsyncpa [#allocation6], 0 }
   0x2   :  { %11 = vsyncpa [#allocation9], 0 }
   0x3   :  { %12 = vsyncpa [#allocation4], 0  ;;  %s784_s15 = smov [#allocation5]   ;;  %s785_s17 = smov [#allocation2]  }
   0x4   :  { %s30_s16 = sshll.u32 %s784_s15, 4  ;;  %s18_s18 = sshll.u32 %s785_s17, 4  ;;  %s31_s16 = int_to_ptr.vmem [resolvable:$true] %s30_s16  ;;  %s817_s18 = int_to_ptr.vmem [resolvable:$true] %s18_s18 }
   0x5   :  { %s666_s21 = scalar_lea.hbm %s1000_s1, 4096 }
   0x6   :  { %p667_p0 = scmp.ne.s32.totalorder %s1000_s1, %s666_s21  ;;  %p670_p1 = scmp.lt.u32.totalorder %s666_s21, %s1000_s1 }
   0x8   :  { %p672_p2 = pnand %p670_p1, %p667_p0 }
   0xa   :  { %675 = shalt.err (!%p672_p2)
}
   0xb   :  { %s676_s26 = scalar_lea.vmem %s31_s16, 4096  ;;  %p681_p4 = scmp.lt.s32.totalorder %s31_s16, %s31_s16 }
   0xc   :  { %p677_p3 = scmp.ne.s32.totalorder %s31_s16, %s676_s26  ;;  %p682_p5 = scmp.lt.s32.totalorder %s676_s26, %s676_s26 }
   0xe   :  { %p683_p6 = por %p682_p5, %p681_p4 }
  0x10   :  { %p684_p7 = pnand %p683_p6, %p677_p3 }
  0x12   :  { %687 = shalt.err (!%p684_p7)
}
  0x13   :  { %s786_s27 = smov 128   ;;  %s787_s28 = smov 8  }
  0x14   :  { %36 = dma.hbm_to_vmem [thread:$0]  %s1000_s1, 4096, %s31_s16, [#allocation6], %s786_s27, %s786_s27, %s787_s28  }
  0x15   :  { %s688_s7 = scalar_lea.hbm %s999_s0, 1024 }
  0x16   :  { %p689_p8 = scmp.ne.s32.totalorder %s999_s0, %s688_s7  ;;  %p692_p9 = scmp.lt.u32.totalorder %s688_s7, %s999_s0 }
  0x18   :  { %p694_p10 = pnand %p692_p9, %p689_p8 }
  0x1a   :  { %697 = shalt.err (!%p694_p10)
}
  0x1b   :  { %s698_s12 = scalar_lea.vmem %s817_s18, 1024  ;;  %p703_p12 = scmp.lt.s32.totalorder %s817_s18, %s817_s18 }
  0x1c   :  { %p699_p11 = scmp.ne.s32.totalorder %s817_s18, %s698_s12  ;;  %p704_p13 = scmp.lt.s32.totalorder %s698_s12, %s698_s12 }
  0x1e   :  { %p705_p0 = por %p704_p13, %p703_p12 }
  0x20   :  { %p706_p1 = pnand %p705_p0, %p699_p11 }
  0x22   :  { %709 = shalt.err (!%p706_p1)
}
  0x23   :  { %24 = dma.hbm_to_vmem [thread:$0]  %s999_s0, 1024, %s817_s18, [#allocation3], %s786_s27, %s786_s27, %s787_s28  }
  0x24   :  { %s788_s14 = smov [#allocation7]   ;;  %s789_s16 = smov [#allocation8]  }
  0x25   :  { %s43_s15 = sshll.u32 %s788_s14, 4  ;;  %s53_s17 = sshll.u32 %s789_s16, 4  ;;  %s44_s15 = int_to_ptr.vmem [resolvable:$true] %s43_s15  ;;  %s54_s17 = int_to_ptr.vmem [resolvable:$true] %s53_s17 }
  0x26   :  { %s710_s21 = scalar_lea.hbm %s1001_s2, 128 }
  0x27   :  { %p711_p2 = scmp.ne.s32.totalorder %s1001_s2, %s710_s21  ;;  %p714_p3 = scmp.lt.u32.totalorder %s710_s21, %s1001_s2 }
  0x29   :  { %p716_p4 = pnand %p714_p3, %p711_p2 }
  0x2b   :  { %719 = shalt.err (!%p716_p4)
}
  0x2c   :  { %s720_s0 = scalar_lea.vmem %s44_s15, 128  ;;  %p725_p6 = scmp.lt.s32.totalorder %s44_s15, %s44_s15 }
  0x2d   :  { %p721_p5 = scmp.ne.s32.totalorder %s44_s15, %s720_s0  ;;  %p726_p7 = scmp.lt.s32.totalorder %s720_s0, %s720_s0 }
  0x2f   :  { %p727_p8 = por %p726_p7, %p725_p6 }
  0x31   :  { %p728_p9 = pnand %p727_p8, %p721_p5 }
  0x33   :  { %731 = shalt.err (!%p728_p9)
}
  0x34   :  { %46 = dma.hbm_to_vmem [thread:$0]  %s1001_s2, 128, %s44_s15, [#allocation6]  }
  0x35   :  { %s732_s5 = scalar_lea.hbm %s1002_s3, 32 }
  0x36   :  { %p733_p10 = scmp.ne.s32.totalorder %s1002_s3, %s732_s5  ;;  %p736_p11 = scmp.lt.u32.totalorder %s732_s5, %s1002_s3 }
  0x38   :  { %p738_p12 = pnand %p736_p11, %p733_p10 }
  0x3a   :  { %741 = shalt.err (!%p738_p12)
}
  0x3b   :  { %s742_s10 = scalar_lea.vmem %s54_s17, 32  ;;  %p747_p0 = scmp.lt.s32.totalorder %s54_s17, %s54_s17 }
  0x3c   :  { %p743_p13 = scmp.ne.s32.totalorder %s54_s17, %s742_s10  ;;  %p748_p1 = scmp.lt.s32.totalorder %s742_s10, %s742_s10 }
  0x3e   :  { %p749_p2 = por %p748_p1, %p747_p0 }
  0x40   :  { %p750_p3 = pnand %p749_p2, %p743_p13 }
  0x42   :  { %753 = shalt.err (!%p750_p3)
}
  0x43   :  { %56 = dma.hbm_to_vmem [thread:$0]  %s1002_s3, 32, %s54_s17, [#allocation9]  }
  0x44   :  { %776 = dma.done.wait [#allocation3], 1024  }
  0x45   :  { %777 = vsyncadd [#allocation3], 4294966272 }
  0x46   :  { %778 = dma.done.wait [#allocation6], 4224  }
  0x47   :  { %779 = vsyncadd [#allocation6], 4294963072 }
  0x48   :  { %780 = dma.done.wait [#allocation9], 32  }
  0x49   :  { %781 = vsyncadd [#allocation9], 4294967264  ;;  %v125_v0 = vld [vmem:[#allocation5 + $0x80] sm:$0xff]  ;;  %v126_v1 = vld [vmem:[#allocation5 + $0x88] sm:$0xff]  ;;  %vm290_vm0 = vcmask 1043456   ;;  %vm265_vm1 = vcmask 31744  }
  0x4a   :  { %v109_v2 = vld [vmem:[#allocation5] sm:$0xff]  ;;  %v609_v3 = vpack.c.bf16 %v126_v1, %v125_v0  ;;  %v110_v4 = vld [vmem:[#allocation5 + $0x8] sm:$0xff]  ;;  %v127_v5 = vld [vmem:[#allocation5 + $0x90] sm:$0xff]  ;;  %s791_s3 = smov [#allocation10]  }
  0x4b   :  { %v128_v6 = vld [vmem:[#allocation5 + $0x98] sm:$0xff]  ;;  %v611_v7 = vpack.c.bf16 %v110_v4, %v109_v2  ;;  %v111_v9 = vld [vmem:[#allocation5 + $0x10] sm:$0xff]  ;;  %v129_v11 = vld [vmem:[#allocation5 + $0xa0] sm:$0xff]  ;;  %s513_s12 = sshll.u32 %s791_s3, 4  ;;  %s514_s12 = int_to_ptr.vmem [resolvable:$true] %s513_s12 }
  0x4c   :  { %v613_v8 = vpack.c.bf16 %v128_v6, %v127_v5  ;;  %v112_v10 = vld [vmem:[#allocation5 + $0x18] sm:$0xff]  ;;  %610 = vmatprep.subr.bf16.mxu0 %v609_v3  ;;  %v130_v12 = vld [vmem:[#allocation5 + $0xa8] sm:$0xff]  ;;  %v113_v15 = vld [vmem:[#allocation5 + $0x20] sm:$0xff]  ;;  %s754_s1 = scalar_lea.vmem %s514_s12, 1024  ;;  %p759_p5 = scmp.lt.s32.totalorder %s514_s12, %s514_s12 }
  0x4d   :  { %612 = vmatpush3.bf16.msra.mxu0 %v611_v7  ;;  %v615_v13 = vpack.c.bf16 %v112_v10, %v111_v9  ;;  %v617_v14 = vpack.c.bf16 %v130_v12, %v129_v11  ;;  %v114_v16 = vld [vmem:[#allocation5 + $0x28] sm:$0xff]  ;;  %v131_v17 = vld [vmem:[#allocation5 + $0xb0] sm:$0xff]  ;;  %v132_v18 = vld [vmem:[#allocation5 + $0xb8] sm:$0xff]  ;;  %p755_p4 = scmp.ne.s32.totalorder %s514_s12, %s754_s1  ;;  %p760_p6 = scmp.lt.s32.totalorder %s754_s1, %s754_s1 }
  0x4e   :  { %614 = vmatprep.subr.bf16.mxu0 %v613_v8  ;;  %v619_v19 = vpack.c.bf16 %v114_v16, %v113_v15  ;;  %v621_v20 = vpack.c.bf16 %v132_v18, %v131_v17  ;;  %v115_v21 = vld [vmem:[#allocation5 + $0x30] sm:$0xff]  ;;  %v116_v22 = vld [vmem:[#allocation5 + $0x38] sm:$0xff]  ;;  %v133_v23 = vld [vmem:[#allocation5 + $0xc0] sm:$0xff] }
  0x4f   :  { %v134_v24 = vld [vmem:[#allocation5 + $0xc8] sm:$0xff]  ;;  %v69_v25 = vld [vmem:[#allocation2] sm:$0xff]  ;;  %v623_v27 = vpack.c.bf16 %v116_v22, %v115_v21  ;;  %v135_v32 = vld [vmem:[#allocation5 + $0xd0] sm:$0xff]  ;;  %p761_p7 = por %p760_p6, %p759_p5 }
  0x50   :  { %v878_v26 = vunpack.c.h.bf16 %v69_v25  ;;  %v625_v28 = vpack.c.bf16 %v134_v24, %v133_v23  ;;  %v117_v29 = vld [vmem:[#allocation5 + $0x40] sm:$0xff]  ;;  %v118_v30 = vld [vmem:[#allocation5 + $0x48] sm:$0xff]  ;;  %v136_v33 = vld [vmem:[#allocation5 + $0xd8] sm:$0xff]  ;;  %v882_v51 = vunpack.c.l.bf16 %v69_v25 }
  0x51   :  { %616 = vmatpush3.bf16.msra.mxu0 %v615_v13  ;;  %v627_v34 = vpack.c.bf16 %v118_v30, %v117_v29  ;;  %v629_v35 = vpack.c.bf16 %v136_v33, %v135_v32  ;;  %v119_v36 = vld [vmem:[#allocation5 + $0x50] sm:$0xff]  ;;  %v120_v37 = vld [vmem:[#allocation5 + $0x58] sm:$0xff]  ;;  %v137_v38 = vld [vmem:[#allocation5 + $0xe0] sm:$0xff]  ;;  %p762_p8 = pnand %p761_p7, %p755_p4 }
  0x52   :  { %618 = vmatprep.subr.bf16.mxu0 %v617_v14  ;;  %v94_v31 = vmul.f32 %v878_v26, %v878_v26  ;;  %v138_v39 = vld [vmem:[#allocation5 + $0xe8] sm:$0xff]  ;;  %v631_v40 = vpack.c.bf16 %v120_v37, %v119_v36  ;;  %v121_v42 = vld [vmem:[#allocation5 + $0x60] sm:$0xff]  ;;  %v139_v44 = vld [vmem:[#allocation5 + $0xf0] sm:$0xff]  ;;  %v93_v55 = vmul.f32 %v882_v51, %v882_v51 }
  0x53   :  { %v633_v41 = vpack.c.bf16 %v138_v39, %v137_v38  ;;  %v122_v43 = vld [vmem:[#allocation5 + $0x68] sm:$0xff]  ;;  %v140_v45 = vld [vmem:[#allocation5 + $0xf8] sm:$0xff]  ;;  %v123_v48 = vld [vmem:[#allocation5 + $0x70] sm:$0xff] }
  0x54   :  { %205 = vmatprep.mubr.f32.mxu0 %v94_v31  ;;  %v635_v46 = vpack.c.bf16 %v122_v43, %v121_v42  ;;  %v637_v47 = vpack.c.bf16 %v140_v45, %v139_v44  ;;  %v124_v49 = vld [vmem:[#allocation5 + $0x78] sm:$0xff]  ;;  %v70_v50 = vld [vmem:[#allocation2 + $0x8] sm:$0xff]  ;;  %v71_v54 = vld [vmem:[#allocation2 + $0x10] sm:$0xff] }
  0x55   :  { %620 = vmatpush3.bf16.msra.mxu0 %v619_v19  ;;  %v639_v52 = vpack.c.bf16 %v124_v49, %v123_v48  ;;  %v884_v53 = vunpack.c.h.bf16 %v70_v50  ;;  %v888_v56 = vunpack.c.l.bf16 %v70_v50  ;;  %v892_v58 = vunpack.c.h.bf16 %v71_v54  ;;  %v72_v59 = vld [vmem:[#allocation2 + $0x18] sm:$0xff]  ;;  %v73_v0 = vld [vmem:[#allocation2 + $0x20] sm:$0xff]  ;;  %v74_v5 = vld [vmem:[#allocation2 + $0x28] sm:$0xff] }
  0x56   :  { %622 = vmatprep.subr.bf16.mxu0 %v621_v20  ;;  %v896_v61 = vunpack.c.l.bf16 %v71_v54  ;;  %v900_v63 = vunpack.c.h.bf16 %v72_v59  ;;  %v904_v2 = vunpack.c.l.bf16 %v72_v59  ;;  %v908_v4 = vunpack.c.h.bf16 %v73_v0  ;;  %v75_v10 = vld [vmem:[#allocation2 + $0x30] sm:$0xff]  ;;  %v76_v15 = vld [vmem:[#allocation2 + $0x38] sm:$0xff]  ;;  %v262_v24 = vld [vmem:[#allocation7] sm:$0xff] }
  0x57   :  { %v96_v57 = vmul.f32 %v884_v53, %v884_v53  ;;  %v95_v60 = vmul.f32 %v888_v56, %v888_v56  ;;  %v98_v62 = vmul.f32 %v892_v58, %v892_v58  ;;  %v912_v7 = vunpack.c.l.bf16 %v73_v0 }
  0x58   :  { %v97_v1 = vmul.f32 %v896_v61, %v896_v61  ;;  %v100_v3 = vmul.f32 %v900_v63, %v900_v63  ;;  %v99_v6 = vmul.f32 %v904_v2, %v904_v2  ;;  %v102_v8 = vmul.f32 %v908_v4, %v908_v4 }
  0x59   :  { %624 = vmatpush3.bf16.msra.mxu0 %v623_v27  ;;  %v916_v9 = vunpack.c.h.bf16 %v74_v5  ;;  %v101_v11 = vmul.f32 %v912_v7, %v912_v7  ;;  %v920_v12 = vunpack.c.l.bf16 %v74_v5  ;;  %v924_v14 = vunpack.c.h.bf16 %v75_v10 }
  0x5a   :  { %626 = vmatprep.subr.bf16.mxu0 %v625_v28  ;;  %v928_v17 = vunpack.c.l.bf16 %v75_v10  ;;  %v932_v19 = vunpack.c.h.bf16 %v76_v15  ;;  %v936_v21 = vunpack.c.l.bf16 %v76_v15  ;;  %v264_v25 = vcombine.high %v262_v24, %v262_v24 }
  0x5b   :  { %v104_v13 = vmul.f32 %v916_v9, %v916_v9  ;;  %v103_v16 = vmul.f32 %v920_v12, %v920_v12  ;;  %v106_v18 = vmul.f32 %v924_v14, %v924_v14  ;;  %v790_v27 = vmov 0.0  }
  0x5c   :  { %v105_v20 = vmul.f32 %v928_v17, %v928_v17  ;;  %v108_v22 = vmul.f32 %v932_v19, %v932_v19  ;;  %v107_v23 = vmul.f32 %v936_v21, %v936_v21  ;;  %527 = vmatprep.subr.msk.mxu1 %vm290_vm0, %v264_v25  ;;  %359 = vmatprep.mubr.f32.mxu1 %v790_v27 }
  0x5d   :  { %628 = vmatpush3.bf16.msra.mxu0 %v627_v34  ;;  %528 = vmatpush1.msk.msra.mxu1 %vm290_vm0, %v262_v24 }
  0x5e   :  { %630 = vmatprep.subr.bf16.mxu0 %v629_v35 }
  0x61   :  { %632 = vmatpush3.bf16.msra.mxu0 %v631_v40 }
  0x62   :  { %634 = vmatprep.subr.bf16.mxu0 %v633_v41 }
  0x65   :  { %636 = vmatpush3.bf16.msra.mxu0 %v635_v46 }
  0x66   :  { %638 = vmatprep.subr.bf16.mxu0 %v637_v47 }
  0x69   :  { %640 = vmatpush3.bf16.msra.mxu0 %v639_v52 }
  0x6c   :  { %206 = vmatmul.mubr.f32.vlgmr.msra.gmra.mrb[0].mxu0 %v93_v55 }
  0x6d   :  { %210 = vmatprep.mubr.f32.mxu0 %v96_v57 }
  0x70   :  { %211 = vmatmul.mubr.f32.gmra.mrb[2].mxu0 %v95_v60 }
  0x71   :  { %215 = vmatprep.mubr.f32.mxu0 %v98_v62 }
  0x74   :  { %216 = vmatmul.mubr.f32.gmra.mrb[4].mxu0 %v97_v1 }
  0x75   :  { %220 = vmatprep.mubr.f32.mxu0 %v100_v3 }
  0x78   :  { %221 = vmatmul.mubr.f32.gmra.mrb[6].mxu0 %v99_v6 }
  0x79   :  { %225 = vmatprep.mubr.f32.mxu0 %v102_v8 }
  0x7c   :  { %226 = vmatmul.mubr.f32.gmra.mrb[8].mxu0 %v101_v11 }
  0x7d   :  { %230 = vmatprep.mubr.f32.mxu0 %v104_v13 }
  0x80   :  { %231 = vmatmul.mubr.f32.gmra.mrb[10].mxu0 %v103_v16  ;;  %v426_v16 = vlaneseq }
  0x81   :  { %235 = vmatprep.mubr.f32.mxu0 %v106_v18 }
  0x82   :  { %v427_v18 = vshrl.u32 %v426_v16, 7 }
  0x84   :  { %236 = vmatmul.mubr.f32.gmra.mrb[12].mxu0 %v105_v20  ;;  %v428_v20 = vsub.s32 0, %v427_v18 }
  0x85   :  { %240 = vmatprep.mubr.f32.mxu0 %v108_v22  ;;  %v424_v22 = vld [vmem:[#allocation8] sm:$0x3] }
  0x86   :  { %v429_v24 = vrot.slane %v424_v22, %v428_v20 }
  0x88   :  { %241 = vmatmul.mubr.f32.gmra.mrb[14].mxu0 %v107_v23  ;;  %v432_v23 = vsub.s32 1, %v427_v18 }
 0x13f   :  { %v585_v28 = vpop.f32.mrb[0].mxu0 }
 0x140   :  { %v586_v29 = vpop.f32.mrb[1].mxu0 }
 0x141   :  { %v587_v30 = vadd.f32 %v586_v29, %v585_v28  ;;  %v958_v28 = vrot.slane %v424_v22, %v432_v23 }
 0x143   :  { %v246_v31 = vmax.f32 %v587_v30, 1e-24  ;;  %v588_v32 = vpop.f32.mrb[2].mxu0 }
 0x144   :  { %v589_v33 = vpop.f32.mrb[3].mxu0 }
 0x145   :  { %650 = vrsqrt.f32 %v246_v31  ;;  %v590_v34 = vadd.f32 %v589_v33, %v588_v32 }
 0x147   :  { %v247_v35 = vmax.f32 %v590_v34, 1e-24  ;;  %v591_v36 = vpop.f32.mrb[4].mxu0 }
 0x148   :  { %v592_v37 = vpop.f32.mrb[5].mxu0 }
 0x149   :  { %652 = vrsqrt.f32 %v247_v35  ;;  %v593_v38 = vadd.f32 %v592_v37, %v591_v36 }
 0x14b   :  { %v248_v39 = vmax.f32 %v593_v38, 1e-24  ;;  %v594_v40 = vpop.f32.mrb[6].mxu0 }
 0x14c   :  { %v595_v41 = vpop.f32.mrb[7].mxu0 }
 0x14d   :  { %654 = vrsqrt.f32 %v248_v39  ;;  %v596_v42 = vadd.f32 %v595_v41, %v594_v40 }
 0x14f   :  { %v651_v43 = vpop.eup %650  ;;  %v249_v44 = vmax.f32 %v596_v42, 1e-24  ;;  %v597_v45 = vpop.f32.mrb[8].mxu0 }
 0x150   :  { %v598_v46 = vpop.f32.mrb[9].mxu0  ;;  %529 = vmatmul.mubr.msk.f32.vlgmr.msra.gmra.mrb[0].mxu1 %vm265_vm1, %v651_v43 }
 0x151   :  { %656 = vrsqrt.f32 %v249_v44  ;;  %v599_v47 = vadd.f32 %v598_v46, %v597_v45  ;;  %365 = vmatprep.mubr.f32.mxu1 %v790_v27 }
 0x153   :  { %v653_v48 = vpop.eup %652  ;;  %v250_v49 = vmax.f32 %v599_v47, 1e-24  ;;  %v600_v50 = vpop.f32.mrb[10].mxu0 }
 0x154   :  { %v601_v52 = vpop.f32.mrb[11].mxu0  ;;  %530 = vmatmul.mubr.msk.f32.gmra.mrb[2].mxu1 %vm265_vm1, %v653_v48 }
 0x155   :  { %658 = vrsqrt.f32 %v250_v49  ;;  %v602_v54 = vadd.f32 %v601_v52, %v600_v50  ;;  %371 = vmatprep.mubr.f32.mxu1 %v790_v27 }
 0x157   :  { %v655_v55 = vpop.eup %654  ;;  %v251_v57 = vmax.f32 %v602_v54, 1e-24  ;;  %v603_v59 = vpop.f32.mrb[12].mxu0 }
 0x158   :  { %v604_v60 = vpop.f32.mrb[13].mxu0  ;;  %531 = vmatmul.mubr.msk.f32.gmra.mrb[4].mxu1 %vm265_vm1, %v655_v55 }
 0x159   :  { %660 = vrsqrt.f32 %v251_v57  ;;  %v605_v62 = vadd.f32 %v604_v60, %v603_v59  ;;  %377 = vmatprep.mubr.f32.mxu1 %v790_v27 }
 0x15b   :  { %v657_v0 = vpop.eup %656  ;;  %v252_v1 = vmax.f32 %v605_v62, 1e-24  ;;  %v606_v3 = vpop.f32.mrb[14].mxu0 }
 0x15c   :  { %v607_v5 = vpop.f32.mrb[15].mxu0  ;;  %532 = vmatmul.mubr.msk.f32.gmra.mrb[6].mxu1 %vm265_vm1, %v657_v0 }
 0x15d   :  { %662 = vrsqrt.f32 %v252_v1  ;;  %v608_v6 = vadd.f32 %v607_v5, %v606_v3  ;;  %383 = vmatprep.mubr.f32.mxu1 %v790_v27 }
 0x15f   :  { %v659_v8 = vpop.eup %658  ;;  %v253_v10 = vmax.f32 %v608_v6, 1e-24 }
 0x160   :  { %533 = vmatmul.mubr.msk.f32.gmra.mrb[8].mxu1 %vm265_vm1, %v659_v8 }
 0x161   :  { %664 = vrsqrt.f32 %v253_v10  ;;  %389 = vmatprep.mubr.f32.mxu1 %v790_v27 }
 0x163   :  { %v661_v11 = vpop.eup %660 }
 0x164   :  { %534 = vmatmul.mubr.msk.f32.gmra.mrb[10].mxu1 %vm265_vm1, %v661_v11 }
 0x165   :  { %395 = vmatprep.mubr.f32.mxu1 %v790_v27 }
 0x167   :  { %v663_v13 = vpop.eup %662 }
 0x168   :  { %535 = vmatmul.mubr.msk.f32.gmra.mrb[12].mxu1 %vm265_vm1, %v663_v13 }
 0x169   :  { %401 = vmatprep.mubr.f32.mxu1 %v790_v27 }
 0x16b   :  { %v665_v15 = vpop.eup %664 }
 0x16c   :  { %536 = vmatmul.mubr.msk.f32.gmra.mrb[14].mxu1 %vm265_vm1, %v665_v15 }
 0x223   :  { %v361_v25 = vpop.f32.mrb[0].mxu1 }
 0x224   :  { %v408_v29 = vmul.f32 %v361_v25, %v882_v51  ;;  %v363_v30 = vpop.f32.mrb[1].mxu1 }
 0x225   :  { %v409_v31 = vmul.f32 %v363_v30, %v878_v26 }
 0x226   :  { %v436_v32 = vmul.f32 %v429_v24, %v408_v29 }
 0x227   :  { %v437_v27 = vmul.f32 %v958_v28, %v409_v31  ;;  %v367_v33 = vpop.f32.mrb[2].mxu1 }
 0x228   :  { %v410_v34 = vmul.f32 %v367_v33, %v888_v56  ;;  %v369_v35 = vpop.f32.mrb[3].mxu1 }
 0x229   :  { %v545_v36 = vpack.c.bf16 %v437_v27, %v436_v32  ;;  %v411_v37 = vmul.f32 %v369_v35, %v884_v53 }
 0x22a   :  { %v438_v38 = vmul.f32 %v429_v24, %v410_v34 }
 0x22b   :  { %500 = vst [vmem:[#allocation10] sm:$0xff] %v545_v36  ;;  %v439_v39 = vmul.f32 %v958_v28, %v411_v37  ;;  %v373_v40 = vpop.f32.mrb[4].mxu1 }
 0x22c   :  { %v412_v51 = vmul.f32 %v373_v40, %v896_v61  ;;  %v375_v41 = vpop.f32.mrb[5].mxu1 }
 0x22d   :  { %v546_v42 = vpack.c.bf16 %v439_v39, %v438_v38  ;;  %v413_v26 = vmul.f32 %v375_v41, %v892_v58 }
 0x22e   :  { %v440_v43 = vmul.f32 %v429_v24, %v412_v51 }
 0x22f   :  { %501 = vst [vmem:[#allocation10 + $0x8] sm:$0xff] %v546_v42  ;;  %v441_v44 = vmul.f32 %v958_v28, %v413_v26  ;;  %v379_v56 = vpop.f32.mrb[6].mxu1 }
 0x230   :  { %v414_v45 = vmul.f32 %v379_v56, %v904_v2  ;;  %v381_v46 = vpop.f32.mrb[7].mxu1 }
 0x231   :  { %v547_v53 = vpack.c.bf16 %v441_v44, %v440_v43  ;;  %v415_v47 = vmul.f32 %v381_v46, %v900_v63 }
 0x232   :  { %v442_v48 = vmul.f32 %v429_v24, %v414_v45 }
 0x233   :  { %502 = vst [vmem:[#allocation10 + $0x10] sm:$0xff] %v547_v53  ;;  %v443_v49 = vmul.f32 %v958_v28, %v415_v47  ;;  %v385_v61 = vpop.f32.mrb[8].mxu1 }
 0x234   :  { %v416_v50 = vmul.f32 %v385_v61, %v912_v7  ;;  %v387_v52 = vpop.f32.mrb[9].mxu1 }
 0x235   :  { %v548_v58 = vpack.c.bf16 %v443_v49, %v442_v48  ;;  %v417_v54 = vmul.f32 %v387_v52, %v908_v4 }
 0x236   :  { %v444_v55 = vmul.f32 %v429_v24, %v416_v50 }
 0x237   :  { %503 = vst [vmem:[#allocation10 + $0x18] sm:$0xff] %v548_v58  ;;  %v445_v57 = vmul.f32 %v958_v28, %v417_v54  ;;  %v391_v2 = vpop.f32.mrb[10].mxu1 }
 0x238   :  { %v418_v59 = vmul.f32 %v391_v2, %v920_v12  ;;  %v393_v60 = vpop.f32.mrb[11].mxu1 }
 0x239   :  { %v549_v63 = vpack.c.bf16 %v445_v57, %v444_v55  ;;  %v419_v62 = vmul.f32 %v393_v60, %v916_v9 }
 0x23a   :  { %v446_v0 = vmul.f32 %v429_v24, %v418_v59 }
 0x23b   :  { %504 = vst [vmem:[#allocation10 + $0x20] sm:$0xff] %v549_v63  ;;  %v447_v1 = vmul.f32 %v958_v28, %v419_v62  ;;  %v397_v7 = vpop.f32.mrb[12].mxu1 }
 0x23c   :  { %v420_v3 = vmul.f32 %v397_v7, %v928_v17  ;;  %v399_v5 = vpop.f32.mrb[13].mxu1 }
 0x23d   :  { %v550_v4 = vpack.c.bf16 %v447_v1, %v446_v0  ;;  %v421_v6 = vmul.f32 %v399_v5, %v924_v14 }
 0x23e   :  { %v448_v8 = vmul.f32 %v429_v24, %v420_v3 }
 0x23f   :  { %505 = vst [vmem:[#allocation10 + $0x28] sm:$0xff] %v550_v4  ;;  %v449_v10 = vmul.f32 %v958_v28, %v421_v6  ;;  %v403_v12 = vpop.f32.mrb[14].mxu1 }
 0x240   :  { %v422_v11 = vmul.f32 %v403_v12, %v936_v21  ;;  %v405_v13 = vpop.f32.mrb[15].mxu1 }
 0x241   :  { %v551_v9 = vpack.c.bf16 %v449_v10, %v448_v8  ;;  %v423_v15 = vmul.f32 %v405_v13, %v932_v19 }
 0x242   :  { %v450_v16 = vmul.f32 %v429_v24, %v422_v11 }
 0x243   :  { %506 = vst [vmem:[#allocation10 + $0x30] sm:$0xff] %v551_v9  ;;  %v451_v17 = vmul.f32 %v958_v28, %v423_v15 }
 0x245   :  { %v552_v18 = vpack.c.bf16 %v451_v17, %v450_v16 }
 0x247   :  { %507 = vst [vmem:[#allocation10 + $0x38] sm:$0xff] %v552_v18 }
 0x248   :  { %765 = shalt.err (!%p762_p8)
}
 0x249   :  { %s766_s15 = scalar_lea.hbm %s1003_s4, 1024 }
 0x24a   :  { %p767_p9 = scmp.ne.s32.totalorder %s1003_s4, %s766_s15  ;;  %p770_p10 = scmp.lt.u32.totalorder %s766_s15, %s1003_s4 }
 0x24c   :  { %p772_p11 = pnand %p770_p10, %p767_p9 }
 0x24e   :  { %775 = shalt.err (!%p772_p11)
}
 0x24f   :  { %519 = dma.vmem_to_hbm [thread:$0]  %s514_s12, 1024, %s1003_s4, [#allocation4], %s786_s27, %s786_s27, %s787_s28  }
 0x250   :  { %782 = dma.done.wait [#allocation4], 1024  }
 0x251   :  { %783 = vsyncadd [#allocation4], 4294966272 }
 0x252   :  { %523 = vsyncpa [#allocation3], 1 }
 0x253   :  { %524 = vsyncpa [#allocation6], 1 }
 0x254   :  { %525 = vsyncpa [#allocation9], 1 }
 0x255   :  { %526 = vsyncpa [#allocation4], 1 }

</bundles_post_ra>
